<compile_context>
chip_gen: v7x
topology: tpu7x:2x2x1
jax: 0.10.0
libtpu: 0.0.40
codegen_flags: <defaults>
</compile_context>

<pallas_src>
import math

import jax
import jax.numpy as jnp
from jax.experimental import pallas as pl
from jax.experimental.pallas import tpu as pltpu


def _causal_conv1d_kernel(x_ref, w_ref, b_ref, o_ref):
    # x_ref : (2*C_in, TL)   stacked taps [x[t-d] ; x[t]] for TL output positions (lane-dense)
    # w_ref : (C_out, 2*C_in) stacked taps [W[:, :, 0] | W[:, :, 1]]
    # b_ref : (C_out, 1)      f32 bias
    # o_ref : (C_out, TL)
    y = jnp.dot(w_ref[...], x_ref[...], preferred_element_type=jnp.float32)
    o_ref[...] = (y + b_ref[...]).astype(o_ref.dtype)


def causal_conv1d(x, weight, bias, dilation=2, lane_tile=512):
    """x: (N, C_in, L); weight: (C_out, C_in, 2); bias: (C_out,). Returns (N, C_out, L)."""
    N, C_in, L = x.shape
    C_out = weight.shape[0]
    d = dilation

    # ---- wrapper layout plumbing (pure XLA data movement, no compute hoisted) ----
    # Causal left zero-pad; the two conv taps become static slices of the padded array.
    x_pad = jnp.pad(x, ((0, 0), (0, 0), (d, 0)))
    x0 = x_pad[:, :, :L]        # x[., ., t - d]  (zeros for t < d)
    x1 = x                      # x[., ., t]
    # Stack the taps along the channel (contraction) axis -> single fused matmul.
    x_cat = jnp.concatenate([x0, x1], axis=1)                  # (N, 2*C_in, L)
    # Lane-dense slab: flatten (N, L) into one wide lane dimension.
    xs = x_cat.transpose(1, 0, 2).reshape(2 * C_in, N * L)     # (2*C_in, N*L)

    w_cat = jnp.concatenate([weight[:, :, 0], weight[:, :, 1]], axis=1)  # (C_out, 2*C_in)
    w_cat = w_cat.astype(x.dtype)
    b2 = bias.astype(jnp.float32).reshape(C_out, 1)

    # ---- lane tiling (multiple of 128, or the full dim when it is small) ----
    M = N * L
    if M <= lane_tile:
        tl = M                              # full-extent block (allowed even if < 128)
        m_pad = M
    else:
        tl = lane_tile                      # multiple of 128; modest so it also fits v7x VMEM
        m_pad = pl.cdiv(M, tl) * tl
        if m_pad != M:
            xs = jnp.pad(xs, ((0, 0), (0, m_pad - M)))
    num_tiles = m_pad // tl

    x_spec_kwargs = {}
    if num_tiles >= 3:
        # Kernel is HBM-bound: a third input buffer hides the fetch of tile i+1.
        x_spec_kwargs["pipeline_mode"] = pl.Buffered(3)

    itemsize = jnp.dtype(x.dtype).itemsize
    cost = pl.CostEstimate(
        flops=2 * C_out * (2 * C_in) * M,
        transcendentals=0,
        bytes_accessed=(2 * C_in * M + C_out * M) * itemsize
        + (C_out * 2 * C_in) * itemsize
        + C_out * 4,
    )

    y_flat = pl.pallas_call(
        _causal_conv1d_kernel,
        out_shape=jax.ShapeDtypeStruct((C_out, m_pad), x.dtype),
        grid_spec=pltpu.PrefetchScalarGridSpec(
            num_scalar_prefetch=0,
            grid=(num_tiles,),
            in_specs=[
                pl.BlockSpec((2 * C_in, tl), lambda i: (0, i), **x_spec_kwargs),
                pl.BlockSpec((C_out, 2 * C_in), lambda i: (0, 0)),
                pl.BlockSpec((C_out, 1), lambda i: (0, 0)),
            ],
            out_specs=pl.BlockSpec((C_out, tl), lambda i: (0, i)),
        ),
        compiler_params=pltpu.CompilerParams(dimension_semantics=("parallel",)),
        cost_estimate=cost,
    )(xs, w_cat, b2)

    # Undo the lane flattening: (C_out, N*L) -> (N, C_out, L).
    y = y_flat[:, :M].reshape(C_out, N, L).transpose(1, 0, 2)
    return y


def _reference(x, weight, bias, dilation=2):
    """Independent reference: dilated conv + slice, mirroring the PyTorch forward."""
    d = dilation
    y_full = jax.lax.conv_general_dilated(
        x,
        weight,
        window_strides=(1,),
        padding=[(d, d)],
        rhs_dilation=(d,),
        dimension_numbers=("NCH", "OIH", "NCH"),
    )
    return y_full[:, :, :-d] + bias[None, :, None]


if __name__ == "__main__":
    batch = 2
    in_channels = 4
    out_channels = 8
    seq_len = 16
    dilation = 2

    key = jax.random.PRNGKey(0)
    kw, kb, kx = jax.random.split(key, 3)

    # Deterministic parameter init mimicking nn.Conv1d default (uniform(-k, k), k=1/sqrt(C_in*ksize)).
    k = 1.0 / math.sqrt(in_channels * 2)
    weight = jax.random.uniform(
        kw, (out_channels, in_channels, 2), jnp.float32, minval=-k, maxval=k
    )
    bias = jax.random.uniform(
        kb, (out_channels,), jnp.float32, minval=-k, maxval=k
    )
    x = jax.random.normal(kx, (batch, in_channels, seq_len), jnp.float32)

    out = causal_conv1d(x, weight, bias, dilation=dilation)
    out = jax.block_until_ready(out)

    ref = _reference(x, weight, bias, dilation=dilation)

    assert out.shape == (batch, out_channels, seq_len), out.shape
    assert jnp.allclose(out, ref, rtol=1e-5, atol=1e-5), "Pallas kernel mismatch vs reference"

    print("KERNEL_OK")
</pallas_src>

<mosaic_0001>
module attributes {stable_mosaic.version = 11 : i64} {
  func.func @_causal_conv1d_kernel(%arg0: i32, %arg1: memref<8x32xf32, #tpu.memory_space<vmem>>, %arg2: memref<8x8xf32, #tpu.memory_space<vmem>>, %arg3: memref<8x1xf32, #tpu.memory_space<vmem>>, %arg4: memref<8x32xf32, #tpu.memory_space<vmem>>) attributes {dimension_semantics = [#tpu.dimension_semantics<parallel>], iteration_bounds = array<i64: 1>, scalar_prefetch = 0 : i64, scratch_operands = 0 : i64, tpu.core_type = #tpu.core_type<tc>, window_params = [{transform_indices = @transform_0, window_bounds = array<i64: 8, 32>}, {pipeline_mode = #tpu.pipeline_mode<synchronous>, transform_indices = @transform_1, window_bounds = array<i64: 8, 8>}, {pipeline_mode = #tpu.pipeline_mode<synchronous>, transform_indices = @transform_2, window_bounds = array<i64: 8, 1>}, {transform_indices = @transform_3, window_bounds = array<i64: 8, 32>}]} {
    %c0 = arith.constant 0 : index
    %c0_0 = arith.constant 0 : index
    %0 = vector.load %arg2[%c0, %c0_0] : memref<8x8xf32, #tpu.memory_space<vmem>>, vector<8x8xf32>
    %c0_1 = arith.constant 0 : index
    %c0_2 = arith.constant 0 : index
    %1 = vector.load %arg1[%c0_1, %c0_2] : memref<8x32xf32, #tpu.memory_space<vmem>>, vector<8x32xf32>
    %cst = arith.constant dense<0.000000e+00> : vector<8x32xf32>
    %2 = tpu.matmul %0, %1, %cst {dimension_numbers = #tpu.dot_dimension_numbers<[1], [0], [0], [1], [0, 0, 1, 1], [], []>} : vector<8x8xf32>, vector<8x32xf32>, vector<8x32xf32> -> vector<8x32xf32>
    %c0_3 = arith.constant 0 : index
    %c0_4 = arith.constant 0 : index
    %3 = vector.load %arg3[%c0_3, %c0_4] : memref<8x1xf32, #tpu.memory_space<vmem>>, vector<8x1xf32>
    %4 = vector.broadcast %3 : vector<8x1xf32> to vector<8x32xf32>
    %5 = arith.addf %2, %4 : vector<8x32xf32>
    %c0_5 = arith.constant 0 : index
    %c0_6 = arith.constant 0 : index
    %6 = vector.load %arg4[%c0_5, %c0_6] : memref<8x32xf32, #tpu.memory_space<vmem>>, vector<8x32xf32>
    tpu.vector_store %arg4[%c0_5, %c0_6], %5 {strides = array<i32>} : memref<8x32xf32, #tpu.memory_space<vmem>>, vector<8x32xf32>,
    return
  }
  func.func @transform_0(%arg0: i32) -> (i32, i32) {
    %c0_i32 = arith.constant 0 : i32
    %c0_i32_0 = arith.constant 0 : i32
    return %c0_i32, %arg0 : i32, i32
  }
  func.func @transform_1(%arg0: i32) -> (i32, i32) {
    %c0_i32 = arith.constant 0 : i32
    %c0_i32_0 = arith.constant 0 : i32
    %c0_i32_1 = arith.constant 0 : i32
    return %c0_i32, %c0_i32_0 : i32, i32
  }
  func.func @transform_2(%arg0: i32) -> (i32, i32) {
    %c0_i32 = arith.constant 0 : i32
    %c0_i32_0 = arith.constant 0 : i32
    %c0_i32_1 = arith.constant 0 : i32
    return %c0_i32, %c0_i32_0 : i32, i32
  }
  func.func @transform_3(%arg0: i32) -> (i32, i32) {
    %c0_i32 = arith.constant 0 : i32
    %c0_i32_0 = arith.constant 0 : i32
    return %c0_i32, %arg0 : i32, i32
  }
}

</mosaic_0001>

<bundles_post_ra>
// kernel: tpu_custom_call.1
= control target key start
LH: loop header
LB: loop body
LE: loop exit
PB: predicated region body
PF: predicated region fallthrough
CT: control target
= control target key end

     0   :  { %8 = vsyncpa [#allocation3], 0  ;;  %s243_s0 = inlined_call_operand.vmem [shape: f32[8,32], index: 0, kind: input, shape index: {}]   ;;  %s244_s1 = inlined_call_operand.hbm [shape: f32[8,8], index: 1, kind: input, shape index: {}]   ;;  %s245_s2 = inlined_call_operand.vmem [shape: f32[8,1], index: 2, kind: input, shape index: {}]   ;;  %s246_s3 = inlined_call_operand.hbm [shape: f32[8,32], index: 3, kind: output, shape index: {}]  }
   0x1   :  { %9 = vsyncpa [#allocation4], 0  ;;  %s188_s12 = smov [#allocation2]   ;;  %s140_s16 = scalar_lea.hbm %s244_s1, 128 }
   0x2   :  { %s18_s13 = sshll.u32 %s188_s12, 4  ;;  %p141_p0 = scmp.ne.s32.totalorder %s244_s1, %s140_s16  ;;  %s19_s13 = int_to_ptr.vmem [resolvable:$true] %s18_s13 }
   0x3   :  { %p144_p1 = scmp.lt.u32.totalorder %s140_s16, %s244_s1 }
   0x5   :  { %p146_p2 = pnand %p144_p1, %p141_p0 }
   0x7   :  { %149 = shalt.err (!%p146_p2)
}
   0x8   :  { %s150_s21 = scalar_lea.vmem %s19_s13, 128  ;;  %p155_p4 = scmp.lt.s32.totalorder %s19_s13, %s19_s13 }
   0x9   :  { %p151_p3 = scmp.ne.s32.totalorder %s19_s13, %s150_s21  ;;  %p156_p5 = scmp.lt.s32.totalorder %s150_s21, %s150_s21 }
   0xb   :  { %p157_p6 = por %p156_p5, %p155_p4 }
   0xd   :  { %p158_p7 = pnand %p157_p6, %p151_p3 }
   0xf   :  { %161 = shalt.err (!%p158_p7)
}
  0x10   :  { %21 = dma.hbm_to_vmem [thread:$0]  %s244_s1, 128, %s19_s13, [#allocation3]  }
  0x11   :  { %184 = dma.done.wait [#allocation3], 128  }
  0x12   :  { %185 = vsyncadd [#allocation3], 4294967168  ;;  %v189_v0 = vmov 0.0   ;;  %vm190_vm0 = vmmov 0   ;;  %v191_v1 = vmov 0   ;;  %vm35_vm1 = vcmask 64512  }
  0x13   :  { %129 = vmatprep.subr.mxu0 %v189_v0  ;;  %131 = vmatprep.mubr.msk.f32.mxu0 %vm190_vm0, %v189_v0  ;;  %v28_v2 = vld [vmem:[%s243_s0] sm:$0xff]  ;;  %s192_s1 = smov [#allocation5]   ;;  %vm109_vm2 = vcmask 261120  }
  0x14   :  { %139 = vset.pattern.permute.xlu0 %v191_v1  ;;  %v27_v3 = vld [vmem:[#allocation2] sm:$0xff]  ;;  %130 = vmatpush3.msra.mxu0 %v28_v2  ;;  %s117_s28 = sshll.u32 %s192_s1, 4  ;;  %s118_s28 = int_to_ptr.vmem [resolvable:$true] %s117_s28 }
  0x15   :  { %v29_v4 = vld [vmem:[%s245_s2] sm:$0xff]  ;;  %132 = vmatmul.mubr.msk.f32.vlgmr.msra.gmra.mrb[0].mxu0 %vm35_vm1, %v27_v3  ;;  %s162_s29 = scalar_lea.vmem %s118_s28, 128  ;;  %p167_p9 = scmp.lt.s32.totalorder %s118_s28, %s118_s28 }
  0x16   :  { %32 = vperm.xlu0 %139, %v29_v4   ;;  %p163_p8 = scmp.ne.s32.totalorder %s118_s28, %s162_s29  ;;  %p168_p10 = scmp.lt.s32.totalorder %s162_s29, %s162_s29 }
  0x18   :  { %p169_p11 = por %p168_p10, %p167_p9 }
  0x1a   :  { %p170_p12 = pnand %p169_p11, %p163_p8 }
  0x95   :  { %v33_v5 = vpop.permute.xlu0 %32 }
  0xe8   :  { %v105_v6 = vpop.f32.mrb[0].mxu0 }
  0xe9   :  { %v106_v7 = vadd.f32 %v105_v6, %v33_v5  ;;  %v133_v8 = vpop.f32.mrb[1].mxu0 }
  0xeb   :  { %110 = vst.msk [vmem:[#allocation5] sm:$0xff] %vm109_vm2, %v106_v7 }
  0xec   :  { %173 = shalt.err (!%p170_p12)
}
  0xed   :  { %s174_s30 = scalar_lea.hbm %s246_s3, 128 }
  0xee   :  { %p175_p13 = scmp.ne.s32.totalorder %s246_s3, %s174_s30  ;;  %p178_p0 = scmp.lt.u32.totalorder %s174_s30, %s246_s3 }
  0xf0   :  { %p180_p1 = pnand %p178_p0, %p175_p13 }
  0xf2   :  { %183 = shalt.err (!%p180_p1)
}
  0xf3   :  { %120 = dma.vmem_to_hbm [thread:$0]  %s118_s28, 128, %s246_s3, [#allocation4]  }
  0xf4   :  { %186 = dma.done.wait [#allocation4], 128  }
  0xf5   :  { %187 = vsyncadd [#allocation4], 4294967168 }
  0xf6   :  { %124 = vsyncpa [#allocation3], 1 }
  0xf7   :  { %125 = vsyncpa [#allocation4], 1 }

</bundles_post_ra>
